<compile_context>
chip_gen: v6e
topology: v6e:2x2x1
jax: 0.10.0
libtpu: 0.0.40
codegen_flags: <defaults>
</compile_context>

<pallas_src>
import jax
import jax.numpy as jnp
from jax.experimental import pallas as pl
from jax.experimental.pallas import tpu as pltpu

NUM_OPS = 3  # conv1x1_a, conv1x1_b, identity
_LANES = 128


def graph_edge_kernel(w_ref, b_ref, x_ref, o_ref):
    # w_ref: (C, C) combined weight; b_ref: (C, 1) combined bias (always f32).
    # x_ref / o_ref: (Nb, C, tm) tile — channels on sublanes, pixels on lanes.
    w = w_ref[...]
    b = b_ref[...]
    nb = x_ref.shape[0]
    for i in range(nb):  # static, small unrolled loop over the batch block
        y = jnp.dot(w, x_ref[i], preferred_element_type=jnp.float32)  # (C, tm) f32
        o_ref[i] = (y + b).astype(o_ref.dtype)                        # f32 epilogue


def graph_edge_forward(x_nchw, op_weights, w0, b0, w1, b1, *,
                       tm=2048, nb=None, stream_dtype=None):
    """GraphEdge forward.

    x_nchw:       (N, C, H, W)
    op_weights:   (NUM_OPS,) raw edge weights (exp taken here, as in the module)
    w0, w1:       (C_out, C_in) 1x1-conv kernels (PyTorch weight squeezed)
    b0, b1:       (C,) biases
    stream_dtype: optional dtype (e.g. jnp.bfloat16) for the streamed x / W
                  operands; accumulation, bias add and output stay f32.
    """
    N, C, H, W = x_nchw.shape
    HW = H * W
    out_dtype = x_nchw.dtype

    # ---- Fold exp(edge weights) into a single combined weight / bias (tiny CxC op).
    ew = jnp.exp(op_weights.astype(jnp.float32))
    w_comb = ew[0] * w0 + ew[1] * w1 + ew[2] * jnp.eye(C, dtype=w0.dtype)
    b_comb = (ew[0] * b0 + ew[1] * b1).reshape(C, 1).astype(jnp.float32)

    # ---- Lane-dense layout: (N, C, H*W); reshape is free (no transpose).
    x_rows = x_nchw.reshape(N, C, HW)
    if stream_dtype is not None:
        x_rows = x_rows.astype(stream_dtype)
        w_comb = w_comb.astype(stream_dtype)
    itemsize = jnp.dtype(x_rows.dtype).itemsize

    # ---- Pixel (lane) tile: round tm down to a lane multiple, clamp to HW extent.
    tm = max(_LANES, (int(tm) // _LANES) * _LANES)
    hw_aligned = pl.cdiv(HW, _LANES) * _LANES
    tm_eff = min(tm, hw_aligned)

    # ---- VMEM budget: 2x double-buffered (x, out) tiles must fit comfortably
    #      even on v7x (64 MiB physical, 32 MiB default scoped).
    vmem_budget = 24 << 20
    max_tm_by_vmem = max(_LANES, (vmem_budget // (4 * C * itemsize) // _LANES) * _LANES)
    tm_eff = min(tm_eff, max_tm_by_vmem)

    # ---- Batch-block over N so each grid step moves >= ~1 MiB (amortizes the
    #      ~0.35us per-step pipeline overhead for small C / small HW).
    per_batch_bytes = 2 * C * tm_eff * itemsize
    if nb is None:
        nb = (1 << 20) // max(per_batch_bytes, 1)
    nb = int(max(1, min(nb, N, 32,
                        vmem_budget // max(4 * C * tm_eff * itemsize, 1))))

    # ---- Megacore: keep at least 2 grid steps when possible (v7x has 2 TCs).
    if pl.cdiv(N, nb) * pl.cdiv(HW, tm_eff) < 2:
        if nb > 1:
            nb = max(1, nb // 2)
        elif tm_eff > _LANES:
            tm_eff = max(_LANES, ((tm_eff // 2) // _LANES) * _LANES)

    grid = (pl.cdiv(N, nb), pl.cdiv(HW, tm_eff))

    flops = 2 * N * HW * C * C
    bytes_accessed = (x_rows.size * itemsize
                      + N * C * HW * jnp.dtype(out_dtype).itemsize
                      + w_comb.size * jnp.dtype(w_comb.dtype).itemsize
                      + b_comb.size * 4)

    out = pl.pallas_call(
        graph_edge_kernel,
        out_shape=jax.ShapeDtypeStruct((N, C, HW), out_dtype),
        grid_spec=pltpu.PrefetchScalarGridSpec(
            num_scalar_prefetch=0,
            grid=grid,
            in_specs=[
                pl.BlockSpec((C, C), lambda n, j: (0, 0)),              # combined weight
                pl.BlockSpec((C, 1), lambda n, j: (0, 0)),              # combined bias
                pl.BlockSpec((nb, C, tm_eff), lambda n, j: (n, 0, j)),  # x tile
            ],
            out_specs=pl.BlockSpec((nb, C, tm_eff), lambda n, j: (n, 0, j)),
        ),
        compiler_params=pltpu.CompilerParams(
            dimension_semantics=("parallel", "parallel"),
        ),
        cost_estimate=pl.CostEstimate(flops=flops, transcendentals=0,
                                      bytes_accessed=int(bytes_accessed)),
    )(w_comb, b_comb, x_rows)

    return out.reshape(N, C, H, W)


def graph_edge_reference(x_nchw, op_weights, w0, b0, w1, b1):
    """Pure-JAX reference of GraphEdge.forward with the three ops above (NCHW)."""
    ew = jnp.exp(op_weights)
    y0 = jnp.einsum('oc,nchw->nohw', w0, x_nchw) + b0[None, :, None, None]
    y1 = jnp.einsum('oc,nchw->nohw', w1, x_nchw) + b1[None, :, None, None]
    y2 = x_nchw
    return ew[0] * y0 + ew[1] * y1 + ew[2] * y2


if __name__ == "__main__":
    # Small, module-consistent shapes.
    N, C, H, W = 2, 8, 16, 16

    key = jax.random.PRNGKey(0)
    k_x, k_w0, k_b0, k_w1, k_b1 = jax.random.split(key, 5)

    x = jax.random.normal(k_x, (N, C, H, W), dtype=jnp.float32)

    # Synthetic params; shapes follow nn.Conv2d(C, C, 1): weight (C_out, C_in, 1, 1)
    # squeezed to (C_out, C_in), bias (C,).
    w0 = jax.random.normal(k_w0, (C, C), dtype=jnp.float32) * 0.1
    b0 = jax.random.normal(k_b0, (C,), dtype=jnp.float32) * 0.1
    w1 = jax.random.normal(k_w1, (C, C), dtype=jnp.float32) * 0.1
    b1 = jax.random.normal(k_b1, (C,), dtype=jnp.float32) * 0.1

    # Default GraphEdge op_weights: ones(num_ops) / num_ops
    op_weights = jnp.ones((NUM_OPS,), dtype=jnp.float32) / NUM_OPS

    out = graph_edge_forward(x, op_weights, w0, b0, w1, b1)
    out = jax.block_until_ready(out)

    ref = graph_edge_reference(x, op_weights, w0, b0, w1, b1)
    assert out.shape == (N, C, H, W)
    assert jnp.allclose(out, ref, atol=1e-5, rtol=1e-5)

    print("KERNEL_OK")
</pallas_src>

<mosaic_0001>
module attributes {stable_mosaic.version = 11 : i64} {
  func.func @graph_edge_kernel(%arg0: i32, %arg1: i32, %arg2: memref<8x8xf32, #tpu.memory_space<vmem>>, %arg3: memref<8x1xf32, #tpu.memory_space<vmem>>, %arg4: memref<1x8x256xf32, #tpu.memory_space<vmem>>, %arg5: memref<1x8x256xf32, #tpu.memory_space<vmem>>) attributes {dimension_semantics = [#tpu.dimension_semantics<parallel>, #tpu.dimension_semantics<parallel>], iteration_bounds = array<i64: 2, 1>, scalar_prefetch = 0 : i64, scratch_operands = 0 : i64, tpu.core_type = #tpu.core_type<tc>, window_params = [{pipeline_mode = #tpu.pipeline_mode<synchronous>, transform_indices = @transform_0, window_bounds = array<i64: 8, 8>}, {pipeline_mode = #tpu.pipeline_mode<synchronous>, transform_indices = @transform_1, window_bounds = array<i64: 8, 1>}, {transform_indices = @transform_2, window_bounds = array<i64: 1, 8, 256>}, {transform_indices = @transform_3, window_bounds = array<i64: 1, 8, 256>}]} {
    %c0 = arith.constant 0 : index
    %c0_0 = arith.constant 0 : index
    %0 = vector.load %arg2[%c0, %c0_0] : memref<8x8xf32, #tpu.memory_space<vmem>>, vector<8x8xf32>
    %c0_1 = arith.constant 0 : index
    %c0_2 = arith.constant 0 : index
    %1 = vector.load %arg3[%c0_1, %c0_2] : memref<8x1xf32, #tpu.memory_space<vmem>>, vector<8x1xf32>
    %c0_3 = arith.constant 0 : index
    %c0_4 = arith.constant 0 : index
    %c0_5 = arith.constant 0 : index
    %2 = vector.load %arg4[%c0_3, %c0_4, %c0_5] : memref<1x8x256xf32, #tpu.memory_space<vmem>>, vector<1x8x256xf32>
    %3 = vector.shape_cast %2 : vector<1x8x256xf32> to vector<8x256xf32>
    %cst = arith.constant dense<0.000000e+00> : vector<8x256xf32>
    %4 = tpu.matmul %0, %3, %cst {dimension_numbers = #tpu.dot_dimension_numbers<[1], [0], [0], [1], [0, 0, 1, 1], [], []>} : vector<8x8xf32>, vector<8x256xf32>, vector<8x256xf32> -> vector<8x256xf32>
    %5 = vector.broadcast %1 : vector<8x1xf32> to vector<8x256xf32>
    %6 = arith.addf %4, %5 : vector<8x256xf32>
    %c0_6 = arith.constant 0 : index
    %c0_7 = arith.constant 0 : index
    %c0_8 = arith.constant 0 : index
    %7 = vector.load %arg5[%c0_6, %c0_7, %c0_8] : memref<1x8x256xf32, #tpu.memory_space<vmem>>, vector<1x8x256xf32>
    %8 = vector.shape_cast %7 : vector<1x8x256xf32> to vector<8x256xf32>
    %9 = vector.shape_cast %6 : vector<8x256xf32> to vector<1x8x256xf32>
    tpu.vector_store %arg5[%c0_6, %c0_7, %c0_8], %9 {strides = array<i32>} : memref<1x8x256xf32, #tpu.memory_space<vmem>>, vector<1x8x256xf32>,
    return
  }
  func.func @transform_0(%arg0: i32, %arg1: i32) -> (i32, i32) {
    %c0_i32 = arith.constant 0 : i32
    %c0_i32_0 = arith.constant 0 : i32
    %c0_i32_1 = arith.constant 0 : i32
    return %c0_i32, %c0_i32_0 : i32, i32
  }
  func.func @transform_1(%arg0: i32, %arg1: i32) -> (i32, i32) {
    %c0_i32 = arith.constant 0 : i32
    %c0_i32_0 = arith.constant 0 : i32
    %c0_i32_1 = arith.constant 0 : i32
    return %c0_i32, %c0_i32_0 : i32, i32
  }
  func.func @transform_2(%arg0: i32, %arg1: i32) -> (i32, i32, i32) {
    %c0_i32 = arith.constant 0 : i32
    %c0_i32_0 = arith.constant 0 : i32
    return %arg0, %c0_i32, %arg1 : i32, i32, i32
  }
  func.func @transform_3(%arg0: i32, %arg1: i32) -> (i32, i32, i32) {
    %c0_i32 = arith.constant 0 : i32
    %c0_i32_0 = arith.constant 0 : i32
    return %arg0, %c0_i32, %arg1 : i32, i32, i32
  }
}

</mosaic_0001>

<bundles_post_ra>
// kernel: tpu_custom_call.1
= control target key start
LH: loop header
LB: loop body
LE: loop exit
PB: predicated region body
PF: predicated region fallthrough
CT: control target
= control target key end

     0   :  { %8 = vsyncpa [#allocation3], 0  ;;  %s751_s0 = inlined_call_operand.vmem [shape: f32[8,8], index: 0, kind: input, shape index: {}]   ;;  %s752_s1 = inlined_call_operand.vmem [shape: f32[8,1], index: 1, kind: input, shape index: {}]   ;;  %s753_s2 = inlined_call_operand.hbm [shape: f32[2,8,256], index: 2, kind: input, shape index: {}]   ;;  %s754_s3 = inlined_call_operand.hbm [shape: f32[2,8,256], index: 3, kind: output, shape index: {}]  }
   0x1   :  { %10 = vsyncpa [#allocation3 + $0x1], 0 }
   0x2   :  { %11 = vsyncpa [#allocation4], 0 }
   0x3   :  { %13 = vsyncpa [#allocation4 + $0x1], 0  ;;  %s611_s12 = smov 0   ;;  %s613_s13 = smov 0  }
   0x4   :  { %s615_s14 = smov 0   ;;  %s617_s15 = smov 0  }
   0x5   :  { %s619_s16 = smov 0   ;;  %s621_s17 = smov 0  }
   0x6 LB: > { %s394_s18 = sadd.s32 4294967295, %s585_s17   ;;  %s395_s19 = sadd.s32 4294967294, %s585_s17   ;;  %s585_s17 = sphi %s621_s17, %s19_s17   ;;  %s581_s16 = sphi %s619_s16, %s766_s16   ;;  %s577_s15 = sphi %s617_s15, %s765_s15   ;;  %s573_s14 = sphi %s615_s14, %s764_s14   ;;  %s569_s13 = sphi %s613_s13, %s763_s13   ;;  %s565_s12 = sphi %s611_s12, %s762_s12  }
   0x7   : > { %s31_s20 = sadd.s32 1, %s581_s16  ;;  %s82_s21 = sadd.s32 1, %s573_s14 }
   0x8   : > { %p33_p0 = scmp.ge.s32.totalorder %s31_s20, 2  ;;  %p89_p1 = scmp.ne.s32.totalorder %s573_s14, %s569_s13 }
   0x9   : > { %p90_p2 = scmp.eq.s32.totalorder %s585_s17, 0  ;;  %p95_p3 = scmp.ne.s32.totalorder %s569_s13, %s565_s12 }
   0xa   : > { %s768_s20 = smov (%p33_p0, %s31_s20), 0  ;;  %p96_p5 = scmp.eq.s32.totalorder %s394_s18, 0 }
   0xb   : > { %p652_p4 = por %p90_p2, %p89_p1  ;;  %s77_s23 = ssub.s32 %s581_s16, %s768_s20 }
   0xc   : > { %p121_p6 = scmp.eq.s32.totalorder %s394_s18, 1  ;;  %p80_p7 = scmp.eq.s32.totalorder %s77_s23, 0 }
   0xd   : > { %p658_p8 = por %p96_p5, %p95_p3  ;;  %p127_p10 = scmp.eq.s32.totalorder %s395_s19, 1 }
   0xe   : > { %p662_p9 = por %p121_p6, %p89_p1  ;;  %p424_p13 = scmp.lt.s32.totalorder %s585_s17, 2 }
   0xf   : > { %s667_s26 = scalar_select %p80_p7, %s573_s14, %s82_s21  }
  0x10   : > { %p669_p11 = por %p127_p10, %p95_p3  ;;  %s153_s28 = sand.u32 1, %s573_s14  }
  0x11   : > { %s398_s29 = sshll.u32 %s153_s28, 4  ;;  %s410_s30 = sshll.u32 %s581_s16, 8 }
  0x12   : > { %s758_s27 = scalar_select %p669_p11, 1, 0 }
  0x13   : > { %s165_s6 = scalar_lea.hbm %s753_s2, %s410_s30  ;;  %s157_s7 = scalar_lea.vmem [#allocation2], %s398_s29 }
  0x14   : > { %s167_s8 = sshll.u32 %s157_s7, 4  ;;  %p682_p0 = pnand %p424_p13, %p652_p4  ;;  %s168_s8 = int_to_ptr.vmem [resolvable:$true] %s167_s8 }
  0x15   : > { %p401_p1 = scmp.ge.s32.totalorder %s585_s17, 1  ;;  %p172_p2 = scmp.lt.s32.totalorder %s585_s17, 3 }
  0x16   : > { %s154_s10 = scalar_lea.sflag [#allocation3], %s153_s28  ;;  %p479_p3 = pneg %p682_p0 }
  0x17   : > { %s490_s11 = scalar_lea.vmem %s168_s8, 256  ;;  %s587_s18 = smov [#allocation2]  }
  0x18   : > { %p491_p5 = scmp.ne.s32.totalorder %s168_s8, %s490_s11  ;;  %s495_s19 = sshll.u32 %s587_s18, 4  ;;  %s496_s19 = int_to_ptr.vmem [resolvable:$false] %s495_s19 }
  0x19   : > { %s497_s21 = scalar_lea.vmem %s496_s19, 512  ;;  %p498_p10 = scmp.lt.s32.totalorder %s168_s8, %s496_s19 }
  0x1a   : > { %p493_p6 = pnand %p491_p5, %p479_p3  ;;  %p499_p12 = scmp.lt.s32.totalorder %s497_s21, %s490_s11 }
  0x1c   : > { %p494_p7 = pneg %p493_p6  ;;  %p500_p4 = por %p499_p12, %p498_p10 }
  0x1e   : > { %p501_p13 = pnand %p500_p4, %p494_p7 }
  0x20   : > { %504 = shalt.err (!%p501_p13)
}
  0x21   : > { %419 = dma.hbm_to_vmem [thread:$0]  (!%p682_p0), %s165_s6, 256, %s168_s8, %s154_s10  }
  0x22   : > { %p173_p11 = pnand %p401_p1, %p172_p2 }
  0x23   : > { %s697_s22 = sand.u32 (!%p173_p11), 1, %s569_s13  }
  0x24   : > { %176 = sbr.rel (%p173_p11) target bundleno = 256 (0x100), region = 32  ;;  %s402_s23 = sshll.u32 (!%p173_p11), %s697_s22, 4 }
  0x25   : > { %s179_s28 = scalar_lea.sflag (!%p173_p11), [#allocation3], %s697_s22  ;;  %s182_s29 = scalar_lea.vmem (!%p173_p11), [#allocation2], %s402_s23 }
  0x29   : > { %556 = dma.done.wait (%p658_p8), %s179_s28, 256  }
  0x2a   : > { %558 = vsyncadd (%p658_p8), %s179_s28, 4294967040  ;;  %v588_v0 = vmov 0.0   ;;  %v589_v1 = vmov 0   ;;  %v210_v2 = vld [vmem:[%s182_s29 + $0x8] sm:$0xff]  ;;  %v209_v3 = vld [vmem:[%s182_s29] sm:$0xff]  ;;  %vm216_vm0 = vcmask 64512  }
  0x2b   : > { %284 = vmatprep.mubr.f32.mxu0 %v588_v0  ;;  %476 = vset.pattern.permute.xlu0 %v589_v1  ;;  %v207_v4 = vld [vmem:[%s751_s0] sm:$0xff]  ;;  %s411_s24 = sshll.u32 %s577_s15, 8  ;;  %s204_s7 = scalar_lea.vmem [#allocation5], %s402_s23 }
  0x2c   : > { %250 = vmatprep.subr.mxu0 %v210_v2  ;;  %v208_v5 = vld [vmem:[%s752_s1] sm:$0xff]  ;;  %s310_s8 = sshll.u32 %s204_s7, 4  ;;  %s308_s11 = scalar_lea.hbm %s754_s3, %s411_s24  ;;  %s311_s8 = int_to_ptr.vmem [resolvable:$true] %s310_s8 }
  0x2d   : > { %251 = vmatpush1.msra.mxu0 %v209_v3  ;;  %213 = vperm.xlu0 %476, %v208_v5   ;;  %s294_s18 = scalar_lea.sflag [#allocation4], %s697_s22  ;;  %s505_s19 = scalar_lea.vmem %s311_s8, 256 }
  0x2e   : > { %404 = vmatmul.mubr.msk.f32.vlgmr.msra.gmra.mxu0 %vm216_vm0, %v207_v4  ;;  %p506_p8 = scmp.ne.s32.totalorder %s311_s8, %s505_s19  ;;  %s590_s21 = smov [#allocation5]  }
  0x2f   : > { %s509_s15 = sshll.u32 %s590_s21, 4  ;;  %s510_s15 = int_to_ptr.vmem [resolvable:$false] %s509_s15 }
  0x30   : > { %p507_p11 = pnand %p506_p8, %p662_p9  ;;  %s511_s23 = scalar_lea.vmem %s510_s15, 512 }
  0x31   : > { %p512_p0 = scmp.lt.s32.totalorder %s311_s8, %s510_s15  ;;  %p513_p1 = scmp.lt.s32.totalorder %s511_s23, %s505_s19 }
  0x32   : > { %p508_p12 = pneg %p507_p11 }
  0x33   : > { %p514_p2 = por %p513_p1, %p512_p0 }
  0x35   : > { %p515_p3 = pnand %p514_p2, %p508_p12 }
  0xa8   : > { %v214_v6 = vpop.permute.xlu0 %213 }
  0xee   : > { %v286_v7 = vpop.f32.mrf.mxu0 }
  0xef   : > { %v287_v8 = vadd.f32 %v286_v7, %v214_v6 }
  0xf0   : > { %v288_v9 = vpop.f32.mrf.mxu0 }
  0xf1   : > { %291 = vst [vmem:[%s204_s7] sm:$0xff] %v287_v8  ;;  %v289_v10 = vadd.f32 %v288_v9, %v214_v6 }
  0xf3   : > { %292 = vst [vmem:[%s204_s7 + $0x8] sm:$0xff] %v289_v10 }
  0xf4   : > { %518 = shalt.err (!%p515_p3)
}
  0xf5   : > { %s519_s28 = scalar_lea.hbm %s308_s11, 256  ;;  %s523_s30 = scalar_lea.hbm %s754_s3, 512 }
  0xf6   : > { %p520_p5 = scmp.ne.s32.totalorder %s308_s11, %s519_s28  ;;  %p524_p10 = scmp.lt.s32.totalorder %s308_s11, %s754_s3 }
  0xf7   : > { %p525_p4 = scmp.lt.s32.totalorder %s523_s30, %s519_s28 }
  0xf8   : > { %p521_p6 = pnand %p520_p5, %p662_p9 }
  0xf9   : > { %p526_p13 = por %p525_p4, %p524_p10 }
  0xfa   : > { %p522_p7 = pneg %p521_p6 }
  0xfc   : > { %p527_p8 = pnand %p526_p13, %p522_p7 }
  0xfe   : > { %530 = shalt.err (!%p527_p8)
}
  0xff   : > { %414 = dma.vmem_to_hbm [thread:$0]  (%p662_p9), %s311_s8, 256, %s308_s11, %s294_s18  }
 0x100 PF: > { %s322_s6 = sand.u32 1, %s565_s12   ;;  %p760_p11 = scmp.ne.s32.totalorder %s758_s27, 0 }
 0x101   : > { %p761_p12 = scmp.ge.s32.totalorder %s585_s17, 2  ;;  %s323_s24 = scalar_lea.sflag [#allocation4], %s322_s6 }
 0x103   : > { %p421_p0 = pnand %p761_p12, %p760_p11 }
 0x105   : > { %p422_p1 = pneg %p421_p0 }
 0x107   : > { %560 = dma.done.wait (%p422_p1), %s323_s24, 256  }
 0x108   : > { %562 = vsyncadd (%p422_p1), %s323_s24, 4294967040  ;;  %s19_s17 = sadd.s32 1, %s585_s17   ;;  %s762_s12 = smov %s569_s13 }
 0x109   : > { %p16_p2 = scmp.ge.s32.totalorder %s19_s17, 4   ;;  %s763_s13 = smov %s573_s14 }
 0x10a   : > { %s764_s14 = smov %s667_s26  ;;  %s765_s15 = smov %s581_s16 }
 0x10b   : > { %s766_s16 = smov %s768_s20  ;;  %18 = sbr.rel (!%p16_p2) target bundleno = 6 (0x6), region = 77 }
 0x110   :  { %328 = vsyncpa [#allocation3], 1 }
 0x111   :  { %330 = vsyncpa [#allocation3 + $0x1], 1 }
 0x112   :  { %331 = vsyncpa [#allocation4], 1 }
 0x113   :  { %333 = vsyncpa [#allocation4 + $0x1], 1 }

</bundles_post_ra>
